<compile_context>
chip_gen: v7x
topology: tpu7x:2x2x1
jax: 0.10.0
libtpu: 0.0.40
codegen_flags: <defaults>
</compile_context>

<pallas_src>
import functools

import jax
import jax.numpy as jnp
from jax.experimental import pallas as pl
from jax.experimental.pallas import tpu as pltpu


def _round_up(x, m):
    return (x + m - 1) // m * m


def _convffn_kernel(x_ref, xp_ref, xn_ref,
                    w1_ref, b1_ref, dw_ref, w2_ref, b2_ref,
                    o_ref, hext_ref, *, t_tile, halo, ksize, t_valid, approx_gelu):
    """One (batch, T-tile) step: fc1 -> GELU -> depthwise conv -> fc2."""
    pad = ksize // 2
    t = pl.program_id(1)
    t_start = t * t_tile
    ext = t_tile + 2 * halo

    # ---- fc1 + GELU on the extended tile: ONE matmul, ONE activation pass ----
    # x / halos are bf16 (wrapper cast); MXU accumulates in f32.
    x_ext = jnp.concatenate([xp_ref[0], x_ref[0], xn_ref[0]], axis=0)   # (ext, C_in)
    h = jnp.dot(x_ext, w1_ref[...], preferred_element_type=jnp.float32) + b1_ref[...]
    hext_ref[...] = jax.nn.gelu(h, approximate=approx_gelu)             # f32 scratch

    # ---- boundary-only zeroing ----
    # Reproduces Conv1d zero padding at the sequence ends, neutralizes the
    # clamped edge halos and the ragged tail (partial edge blocks read
    # unspecified data).  Interior tiles skip this pass entirely.
    needs_mask = (t == 0) | (t_start + t_tile + halo > t_valid)

    @pl.when(needs_mask)
    def _():
        pos = (t_start - halo) + jax.lax.broadcasted_iota(jnp.int32, (ext, 1), 0)
        hext_ref[...] = jnp.where((pos >= 0) & (pos < t_valid), hext_ref[...], 0.0)

    # ---- depthwise temporal conv (stride 1, 'same' length) ----
    # out[t, c] = sum_k dw[k, c] * h[t + k - pad, c]; taps read via ref windows
    # (pl.ds) so shifted views don't materialize full VMEM copies.
    dw = dw_ref[...]                                                    # (K, H) f32
    acc = hext_ref[pl.ds(halo - pad, t_tile), :] * dw[0:1, :]
    for kk in range(1, ksize):                                          # static unroll
        acc = acc + hext_ref[pl.ds(halo - pad + kk, t_tile), :] * dw[kk:kk + 1, :]

    # ---- fc2 (depthwise bias pre-folded into b2 in the wrapper) ----
    out = jnp.dot(acc.astype(jnp.bfloat16), w2_ref[...],
                  preferred_element_type=jnp.float32) + b2_ref[...]
    o_ref[0] = out.astype(o_ref.dtype)


@functools.partial(jax.jit,
                   static_argnames=("kernel_size", "stride", "t_tile", "approx_gelu"))
def conv_ffn(x_nct, params, *, kernel_size, stride=1, t_tile=None, approx_gelu=True):
    """x_nct: (B, C_in, T) float32 (Conv1d layout). Returns (B, C_out, T) float32."""
    if stride != 1:
        # TODO(synk): stride > 1 downsampling path (output length change) not implemented.
        raise NotImplementedError("conv_ffn Pallas kernel supports stride == 1 only")
    # TODO(synk): even kernel_size with padding=K//2 changes the output length in
    # PyTorch; this kernel assumes odd K ('same' length).

    B, C_in, T = x_nct.shape
    H = params["w1"].shape[1]
    C_out = params["w2"].shape[1]
    pad = kernel_size // 2

    # Halo rows: cover K//2, keep bf16 sublane packing friendly (multiple of 16).
    halo = _round_up(max(pad, 1), 16)

    # Generation-aware VMEM budget / tile size (v5e/v6e: 128 MiB; v7x: 64 MiB/TC).
    try:
        vmem_cap = int(pltpu.get_tpu_info().vmem_capacity_bytes)
    except Exception:
        vmem_cap = 64 * 1024 * 1024        # conservative fallback (v7x-sized)
    vmem_limit = max(32 * 1024 * 1024, min(vmem_cap * 5 // 8, 100 * 1024 * 1024))

    if t_tile is None:
        t_tile = 512 if vmem_cap >= 100 * 1024 * 1024 else 256
        # Keep the f32 extended hidden well inside the scoped budget (large H).
        while t_tile > halo and (t_tile + 2 * halo) * H * 4 > vmem_limit // 4:
            t_tile //= 2
        if B == 1:
            # v7x megacore: leave >= 2 T-tiles so both TensorCores get work.
            t_tile = min(t_tile, _round_up(max((T + 1) // 2, halo), halo))
    t_tile = max(halo, _round_up(min(t_tile, _round_up(T, halo)), halo))

    n_t = -(-T // t_tile)                  # partial edge blocks handle the tail
    nb_tile = t_tile // halo
    nb_total = -(-T // halo)

    # Channels-last, bf16 (MXU operand dtype): halves x / halo DMA bytes.
    x = jnp.transpose(x_nct, (0, 2, 1)).astype(jnp.bfloat16)            # (B, T, C_in)

    w1 = params["w1"].astype(jnp.bfloat16)
    b1 = params["b1"].astype(jnp.float32)
    dw_w = params["dw_w"].astype(jnp.float32)
    w2 = params["w2"].astype(jnp.bfloat16)
    # Fold the depthwise bias through fc2 (exact in f32): (acc+db)@W2+b2 = acc@W2 + (db@W2+b2).
    b2_eff = (params["dw_b"].astype(jnp.float32) @ params["w2"].astype(jnp.float32)
              + params["b2"].astype(jnp.float32))

    def cur_map(b, t):
        return (b, t, 0)

    def prev_map(b, t):                    # tail HALO rows of previous tile (clamped)
        return (b, jnp.maximum(t * nb_tile - 1, 0), 0)

    def next_map(b, t):                    # head HALO rows of next tile (clamped)
        return (b, jnp.minimum((t + 1) * nb_tile, nb_total - 1), 0)

    def w_map(b, t):
        return (0, 0)

    weights = [w1, b1, dw_w, w2, b2_eff]
    in_specs = [
        pl.BlockSpec((1, t_tile, C_in), cur_map),
        pl.BlockSpec((1, halo, C_in), prev_map),
        pl.BlockSpec((1, halo, C_in), next_map),
    ] + [pl.BlockSpec(tuple(w.shape), w_map) for w in weights]

    kernel = functools.partial(
        _convffn_kernel, t_tile=t_tile, halo=halo, ksize=kernel_size,
        t_valid=T, approx_gelu=approx_gelu)

    out = pl.pallas_call(
        kernel,
        out_shape=jax.ShapeDtypeStruct((B, T, C_out), jnp.float32),
        grid_spec=pltpu.PrefetchScalarGridSpec(
            num_scalar_prefetch=0,
            grid=(B, n_t),
            in_specs=in_specs,
            out_specs=pl.BlockSpec((1, t_tile, C_out), cur_map),
            scratch_shapes=[pltpu.VMEM((t_tile + 2 * halo, H), jnp.float32)],
        ),
        compiler_params=pltpu.CompilerParams(
            dimension_semantics=("parallel", "parallel"),
            vmem_limit_bytes=vmem_limit,
        ),
    )(x, x, x, *weights)

    return jnp.transpose(out, (0, 2, 1))


def init_params(key, in_channels, hidden_channels, kernel_size, out_channels):
    """Random ConvFFN parameters, channels-last matmul layout.
    fc1/fc2 weights stored bf16 (MXU operands); biases / depthwise taps f32."""
    ks = jax.random.split(key, 6)

    def nrm(k, shape, scale):
        return (scale * jax.random.normal(k, shape)).astype(jnp.float32)

    p = {}
    p["w1"] = nrm(ks[0], (in_channels, hidden_channels), 0.2).astype(jnp.bfloat16)
    p["b1"] = nrm(ks[1], (1, hidden_channels), 0.02)
    p["dw_w"] = nrm(ks[2], (kernel_size, hidden_channels), 0.3)   # [k, c] = torch w[c, 0, k]
    p["dw_b"] = nrm(ks[3], (1, hidden_channels), 0.02)
    p["w2"] = nrm(ks[4], (hidden_channels, out_channels), 0.2).astype(jnp.bfloat16)
    p["b2"] = nrm(ks[5], (1, out_channels), 0.02)
    return p


def conv_ffn_ref(x_nct, params, kernel_size, approx_gelu=True):
    """Pure-JAX f32 reference (same math as the PyTorch module, stride=1)."""
    B, C_in, T = x_nct.shape
    pad = kernel_size // 2
    w1 = params["w1"].astype(jnp.float32)
    w2 = params["w2"].astype(jnp.float32)
    x = jnp.transpose(x_nct, (0, 2, 1))
    h = jnp.einsum("btc,ch->bth", x, w1) + params["b1"]
    h = jax.nn.gelu(h, approximate=approx_gelu)
    hp = jnp.pad(h, ((0, 0), (pad, pad), (0, 0)))
    acc = jnp.zeros_like(h)
    for k in range(kernel_size):
        acc = acc + hp[:, k:k + T, :] * params["dw_w"][k][None, None, :]
    acc = acc + params["dw_b"]
    out = jnp.einsum("bth,ho->bto", acc, w2) + params["b2"]
    return jnp.transpose(out, (0, 2, 1))


if __name__ == "__main__":
    key = jax.random.PRNGKey(0)
    kx, kp = jax.random.split(key)

    # Small test shapes; T=80 with t_tile=32 exercises multi-tile halos and
    # the ragged-tail (partial edge block) path (3 T-tiles, last one partial).
    B, C_in, T = 2, 32, 80
    hidden, C_out, K = 64, 32, 3

    x = jax.random.normal(kx, (B, C_in, T), jnp.float32)
    params = init_params(kp, C_in, hidden, K, C_out)

    # Reference uses the same (tanh) GELU form; pass approx_gelu=False to the
    # kernel for exact-erf parity with nn.GELU() if required.
    ref = conv_ffn_ref(x, params, K, approx_gelu=True)

    # 1) explicit small tile: multi-tile halo + tail masking path.
    out = conv_ffn(x, params, kernel_size=K, stride=1, t_tile=32)
    jax.block_until_ready(out)
    assert out.shape == (B, C_out, T) and out.dtype == jnp.float32
    err = float(jnp.max(jnp.abs(out - ref)))
    assert err < 5e-2, f"max abs err {err}"

    # 2) default generation-aware tile path (single tile covering T here).
    out2 = conv_ffn(x, params, kernel_size=K, stride=1)
    jax.block_until_ready(out2)
    err2 = float(jnp.max(jnp.abs(out2 - ref)))
    assert err2 < 5e-2, f"max abs err {err2}"

    print("KERNEL_OK")
</pallas_src>

<mosaic_0001>
module attributes {stable_mosaic.version = 11 : i64} {
  func.func @_convffn_kernel(%arg0: i32, %arg1: i32, %arg2: memref<1x32x32xbf16, #tpu.memory_space<vmem>>, %arg3: memref<1x16x32xbf16, #tpu.memory_space<vmem>>, %arg4: memref<1x16x32xbf16, #tpu.memory_space<vmem>>, %arg5: memref<32x64xbf16, #tpu.memory_space<vmem>>, %arg6: memref<1x64xf32, #tpu.memory_space<vmem>>, %arg7: memref<3x64xf32, #tpu.memory_space<vmem>>, %arg8: memref<64x32xbf16, #tpu.memory_space<vmem>>, %arg9: memref<1x32xf32, #tpu.memory_space<vmem>>, %arg10: memref<1x32x32xf32, #tpu.memory_space<vmem>>, %arg11: memref<64x64xf32, #tpu.memory_space<vmem>>) attributes {dimension_semantics = [#tpu.dimension_semantics<parallel>, #tpu.dimension_semantics<parallel>], iteration_bounds = array<i64: 2, 3>, scalar_prefetch = 0 : i64, scratch_operands = 1 : i64, tpu.core_type = #tpu.core_type<tc>, window_params = [{transform_indices = @transform_0, window_bounds = array<i64: 1, 32, 32>}, {transform_indices = @transform_1, window_bounds = array<i64: 1, 16, 32>}, {transform_indices = @transform_2, window_bounds = array<i64: 1, 16, 32>}, {pipeline_mode = #tpu.pipeline_mode<synchronous>, transform_indices = @transform_3, window_bounds = array<i64: 32, 64>}, {pipeline_mode = #tpu.pipeline_mode<synchronous>, transform_indices = @transform_4, window_bounds = array<i64: 1, 64>}, {pipeline_mode = #tpu.pipeline_mode<synchronous>, transform_indices = @transform_5, window_bounds = array<i64: 3, 64>}, {pipeline_mode = #tpu.pipeline_mode<synchronous>, transform_indices = @transform_6, window_bounds = array<i64: 64, 32>}, {pipeline_mode = #tpu.pipeline_mode<synchronous>, transform_indices = @transform_7, window_bounds = array<i64: 1, 32>}, {transform_indices = @transform_8, window_bounds = array<i64: 1, 32, 32>}]} {
    %c32_i32 = arith.constant 32 : i32
    %0 = arith.muli %arg1, %c32_i32 : i32
    %c0 = arith.constant 0 : index
    %c0_0 = arith.constant 0 : index
    %c0_1 = arith.constant 0 : index
    %1 = vector.load %arg3[%c0, %c0_0, %c0_1] : memref<1x16x32xbf16, #tpu.memory_space<vmem>>, vector<1x16x32xbf16>
    %2 = vector.shape_cast %1 : vector<1x16x32xbf16> to vector<16x32xbf16>
    %c0_2 = arith.constant 0 : index
    %c0_3 = arith.constant 0 : index
    %c0_4 = arith.constant 0 : index
    %3 = vector.load %arg2[%c0_2, %c0_3, %c0_4] : memref<1x32x32xbf16, #tpu.memory_space<vmem>>, vector<1x32x32xbf16>
    %4 = vector.shape_cast %3 : vector<1x32x32xbf16> to vector<32x32xbf16>
    %c0_5 = arith.constant 0 : index
    %c0_6 = arith.constant 0 : index
    %c0_7 = arith.constant 0 : index
    %5 = vector.load %arg4[%c0_5, %c0_6, %c0_7] : memref<1x16x32xbf16, #tpu.memory_space<vmem>>, vector<1x16x32xbf16>
    %6 = vector.shape_cast %5 : vector<1x16x32xbf16> to vector<16x32xbf16>
    %7 = tpu.concatenate %2, %4, %6 in 0 : vector<16x32xbf16>, vector<32x32xbf16>, vector<16x32xbf16> -> vector<64x32xbf16>
    %c0_8 = arith.constant 0 : index
    %c0_9 = arith.constant 0 : index
    %8 = vector.load %arg5[%c0_8, %c0_9] : memref<32x64xbf16, #tpu.memory_space<vmem>>, vector<32x64xbf16>
    %cst = arith.constant dense<0.000000e+00> : vector<64x64xf32>
    %9 = tpu.matmul %7, %8, %cst {dimension_numbers = #tpu.dot_dimension_numbers<[1], [0], [0], [1], [0, 0, 1, 1], [], []>} : vector<64x32xbf16>, vector<32x64xbf16>, vector<64x64xf32> -> vector<64x64xf32>
    %c0_10 = arith.constant 0 : index
    %c0_11 = arith.constant 0 : index
    %10 = vector.load %arg6[%c0_10, %c0_11] : memref<1x64xf32, #tpu.memory_space<vmem>>, vector<1x64xf32>
    %11 = vector.broadcast %10 : vector<1x64xf32> to vector<64x64xf32>
    %12 = arith.addf %9, %11 : vector<64x64xf32>
    %13 = arith.mulf %12, %12 : vector<64x64xf32>
    %14 = arith.mulf %12, %13 : vector<64x64xf32>
    %cst_12 = arith.constant 4.471500e-02 : f32
    %15 = vector.broadcast %cst_12 : f32 to vector<64x64xf32>
    %16 = arith.mulf %15, %14 : vector<64x64xf32>
    %17 = arith.addf %12, %16 : vector<64x64xf32>
    %cst_13 = arith.constant 0.797884583 : f32
    %18 = vector.broadcast %cst_13 : f32 to vector<64x64xf32>
    %19 = arith.mulf %18, %17 : vector<64x64xf32>
    %20 = math.tanh %19 : vector<64x64xf32>
    %cst_14 = arith.constant 1.000000e+00 : f32
    %21 = vector.broadcast %cst_14 : f32 to vector<64x64xf32>
    %22 = arith.addf %21, %20 : vector<64x64xf32>
    %cst_15 = arith.constant 5.000000e-01 : f32
    %23 = vector.broadcast %cst_15 : f32 to vector<64x64xf32>
    %24 = arith.mulf %23, %22 : vector<64x64xf32>
    %25 = arith.mulf %12, %24 : vector<64x64xf32>
    %c0_16 = arith.constant 0 : index
    %c0_17 = arith.constant 0 : index
    %26 = vector.load %arg11[%c0_16, %c0_17] : memref<64x64xf32, #tpu.memory_space<vmem>>, vector<64x64xf32>
    tpu.vector_store %arg11[%c0_16, %c0_17], %25 {strides = array<i32>} : memref<64x64xf32, #tpu.memory_space<vmem>>, vector<64x64xf32>,
    %c0_i32 = arith.constant 0 : i32
    %27 = arith.cmpi eq, %arg1, %c0_i32 : i32
    %c32_i32_18 = arith.constant 32 : i32
    %28 = arith.addi %0, %c32_i32_18 : i32
    %c16_i32 = arith.constant 16 : i32
    %29 = arith.addi %28, %c16_i32 : i32
    %c80_i32 = arith.constant 80 : i32
    %30 = arith.cmpi sgt, %29, %c80_i32 : i32
    %31 = arith.ori %27, %30 : i1
    %32 = arith.extui %31 : i1 to i32
    %c0_i32_19 = arith.constant 0 : i32
    %33 = arith.cmpi ne, %32, %c0_i32_19 : i32
    scf.if %33 {
      %c16_i32_33 = arith.constant 16 : i32
      %58 = arith.subi %0, %c16_i32_33 : i32
      %59 = tpu.iota {dimensions = array<i32: 0>} : vector<64x1xi32>
      %60 = vector.broadcast %58 : i32 to vector<64x1xi32>
      %61 = arith.addi %60, %59 : vector<64x1xi32>
      %c0_i32_34 = arith.constant 0 : i32
      %62 = vector.broadcast %c0_i32_34 : i32 to vector<64x1xi32>
      %63 = arith.cmpi sge, %61, %62 : vector<64x1xi32>
      %c80_i32_35 = arith.constant 80 : i32
      %64 = vector.broadcast %c80_i32_35 : i32 to vector<64x1xi32>
      %65 = arith.cmpi slt, %61, %64 : vector<64x1xi32>
      %66 = arith.andi %63, %65 : vector<64x1xi1>
      %c0_36 = arith.constant 0 : index
      %c0_37 = arith.constant 0 : index
      %67 = vector.load %arg11[%c0_36, %c0_37] : memref<64x64xf32, #tpu.memory_space<vmem>>, vector<64x64xf32>
      %cst_38 = arith.constant 0.000000e+00 : f32
      %68 = vector.shape_cast %66 : vector<64x1xi1> to vector<64x1xi1>
      %69 = vector.broadcast %68 : vector<64x1xi1> to vector<64x64xi1>
      %70 = vector.broadcast %cst_38 : f32 to vector<64x64xf32>
      %71 = arith.select %69, %67, %70 : vector<64x64xi1>, vector<64x64xf32>
      %c0_39 = arith.constant 0 : index
      %c0_40 = arith.constant 0 : index
      %72 = vector.load %arg11[%c0_39, %c0_40] : memref<64x64xf32, #tpu.memory_space<vmem>>, vector<64x64xf32>
      tpu.vector_store %arg11[%c0_39, %c0_40], %71 {strides = array<i32>} : memref<64x64xf32, #tpu.memory_space<vmem>>, vector<64x64xf32>,
    } else {
    }
    %c0_20 = arith.constant 0 : index
    %c0_21 = arith.constant 0 : index
    %34 = vector.load %arg7[%c0_20, %c0_21] : memref<3x64xf32, #tpu.memory_space<vmem>>, vector<3x64xf32>
    %c15 = arith.constant 15 : index
    %c0_22 = arith.constant 0 : index
    %35 = vector.load %arg11[%c15, %c0_22] : memref<64x64xf32, #tpu.memory_space<vmem>>, vector<32x64xf32>
    %36 = vector.extract_strided_slice %34 {offsets = [0, 0], sizes = [1, 64], strides = [1, 1]} : vector<3x64xf32> to vector<1x64xf32>
    %37 = vector.broadcast %36 : vector<1x64xf32> to vector<32x64xf32>
    %38 = arith.mulf %35, %37 : vector<32x64xf32>
    %c16 = arith.constant 16 : index
    %c0_23 = arith.constant 0 : index
    %39 = vector.load %arg11[%c16, %c0_23] : memref<64x64xf32, #tpu.memory_space<vmem>>, vector<32x64xf32>
    %40 = vector.extract_strided_slice %34 {offsets = [1, 0], sizes = [1, 64], strides = [1, 1]} : vector<3x64xf32> to vector<1x64xf32>
    %41 = vector.broadcast %40 : vector<1x64xf32> to vector<32x64xf32>
    %42 = arith.mulf %39, %41 : vector<32x64xf32>
    %43 = arith.addf %38, %42 : vector<32x64xf32>
    %c17 = arith.constant 17 : index
    %c0_24 = arith.constant 0 : index
    %44 = vector.load %arg11[%c17, %c0_24] : memref<64x64xf32, #tpu.memory_space<vmem>>, vector<32x64xf32>
    %45 = vector.extract_strided_slice %34 {offsets = [2, 0], sizes = [1, 64], strides = [1, 1]} : vector<3x64xf32> to vector<1x64xf32>
    %46 = vector.broadcast %45 : vector<1x64xf32> to vector<32x64xf32>
    %47 = arith.mulf %44, %46 : vector<32x64xf32>
    %48 = arith.addf %43, %47 : vector<32x64xf32>
    %49 = arith.truncf %48 : vector<32x64xf32> to vector<32x64xbf16>
    %c0_25 = arith.constant 0 : index
    %c0_26 = arith.constant 0 : index
    %50 = vector.load %arg8[%c0_25, %c0_26] : memref<64x32xbf16, #tpu.memory_space<vmem>>, vector<64x32xbf16>
    %cst_27 = arith.constant dense<0.000000e+00> : vector<32x32xf32>
    %51 = tpu.matmul %49, %50, %cst_27 {dimension_numbers = #tpu.dot_dimension_numbers<[1], [0], [0], [1], [0, 0, 1, 1], [], []>} : vector<32x64xbf16>, vector<64x32xbf16>, vector<32x32xf32> -> vector<32x32xf32>
    %c0_28 = arith.constant 0 : index
    %c0_29 = arith.constant 0 : index
    %52 = vector.load %arg9[%c0_28, %c0_29] : memref<1x32xf32, #tpu.memory_space<vmem>>, vector<1x32xf32>
    %53 = vector.broadcast %52 : vector<1x32xf32> to vector<32x32xf32>
    %54 = arith.addf %51, %53 : vector<32x32xf32>
    %c0_30 = arith.constant 0 : index
    %c0_31 = arith.constant 0 : index
    %c0_32 = arith.constant 0 : index
    %55 = vector.load %arg10[%c0_30, %c0_31, %c0_32] : memref<1x32x32xf32, #tpu.memory_space<vmem>>, vector<1x32x32xf32>
    %56 = vector.shape_cast %55 : vector<1x32x32xf32> to vector<32x32xf32>
    %57 = vector.shape_cast %54 : vector<32x32xf32> to vector<1x32x32xf32>
    tpu.vector_store %arg10[%c0_30, %c0_31, %c0_32], %57 {strides = array<i32>} : memref<1x32x32xf32, #tpu.memory_space<vmem>>, vector<1x32x32xf32>,
    return
  }
  func.func @transform_0(%arg0: i32, %arg1: i32) -> (i32, i32, i32) {
    %c0_i32 = arith.constant 0 : i32
    %c0_i32_0 = arith.constant 0 : i32
    return %arg0, %arg1, %c0_i32 : i32, i32, i32
  }
  func.func @transform_1(%arg0: i32, %arg1: i32) -> (i32, i32, i32) {
    %c2_i32 = arith.constant 2 : i32
    %0 = arith.muli %arg1, %c2_i32 : i32
    %c1_i32 = arith.constant 1 : i32
    %1 = arith.subi %0, %c1_i32 : i32
    %c0_i32 = arith.constant 0 : i32
    %2 = arith.maxsi %1, %c0_i32 : i32
    %c0_i32_0 = arith.constant 0 : i32
    %c0_i32_1 = arith.constant 0 : i32
    return %arg0, %2, %c0_i32_0 : i32, i32, i32
  }
  func.func @transform_2(%arg0: i32, %arg1: i32) -> (i32, i32, i32) {
    %c1_i32 = arith.constant 1 : i32
    %0 = arith.addi %arg1, %c1_i32 : i32
    %c2_i32 = arith.constant 2 : i32
    %1 = arith.muli %0, %c2_i32 : i32
    %c4_i32 = arith.constant 4 : i32
    %2 = arith.minsi %1, %c4_i32 : i32
    %c0_i32 = arith.constant 0 : i32
    %c0_i32_0 = arith.constant 0 : i32
    return %arg0, %2, %c0_i32 : i32, i32, i32
  }
  func.func @transform_3(%arg0: i32, %arg1: i32) -> (i32, i32) {
    %c0_i32 = arith.constant 0 : i32
    %c0_i32_0 = arith.constant 0 : i32
    %c0_i32_1 = arith.constant 0 : i32
    return %c0_i32, %c0_i32_0 : i32, i32
  }
  func.func @transform_4(%arg0: i32, %arg1: i32) -> (i32, i32) {
    %c0_i32 = arith.constant 0 : i32
    %c0_i32_0 = arith.constant 0 : i32
    %c0_i32_1 = arith.constant 0 : i32
    return %c0_i32, %c0_i32_0 : i32, i32
  }
  func.func @transform_5(%arg0: i32, %arg1: i32) -> (i32, i32) {
    %c0_i32 = arith.constant 0 : i32
    %c0_i32_0 = arith.constant 0 : i32
    %c0_i32_1 = arith.constant 0 : i32
    return %c0_i32, %c0_i32_0 : i32, i32
  }
  func.func @transform_6(%arg0: i32, %arg1: i32) -> (i32, i32) {
    %c0_i32 = arith.constant 0 : i32
    %c0_i32_0 = arith.constant 0 : i32
    %c0_i32_1 = arith.constant 0 : i32
    return %c0_i32, %c0_i32_0 : i32, i32
  }
  func.func @transform_7(%arg0: i32, %arg1: i32) -> (i32, i32) {
    %c0_i32 = arith.constant 0 : i32
    %c0_i32_0 = arith.constant 0 : i32
    %c0_i32_1 = arith.constant 0 : i32
    return %c0_i32, %c0_i32_0 : i32, i32
  }
  func.func @transform_8(%arg0: i32, %arg1: i32) -> (i32, i32, i32) {
    %c0_i32 = arith.constant 0 : i32
    %c0_i32_0 = arith.constant 0 : i32
    return %arg0, %arg1, %c0_i32 : i32, i32, i32
  }
}

</mosaic_0001>

<bundles_post_ra>
// kernel: conv_ffn.1
= control target key start
LH: loop header
LB: loop body
LE: loop exit
PB: predicated region body
PF: predicated region fallthrough
CT: control target
= control target key end

     0   :  { %s1908_s0 = inlined_call_operand.vmem [shape: bf16[2,80,32], index: 0, kind: input, shape index: {}, may-alias: {0,1,2}]   ;;  %s1909_s1 = inlined_call_operand.vmem [shape: bf16[2,80,32], index: 1, kind: input, shape index: {}, may-alias: {0,1,2}]   ;;  %s1910_s2 = inlined_call_operand.vmem [shape: bf16[2,80,32], index: 2, kind: input, shape index: {}, may-alias: {0,1,2}]   ;;  %s1911_s3 = inlined_call_operand.vmem [shape: bf16[32,64], index: 3, kind: input, shape index: {}]   ;;  %s1912_s4 = inlined_call_operand.vmem [shape: f32[1,64], index: 4, kind: input, shape index: {}]   ;;  %s1913_s5 = inlined_call_operand.vmem [shape: f32[3,64], index: 5, kind: input, shape index: {}]   ;;  %s1914_s6 = inlined_call_operand.vmem [shape: bf16[64,32], index: 6, kind: input, shape index: {}]   ;;  %s1915_s7 = inlined_call_operand.vmem [shape: f32[1,32], index: 7, kind: input, shape index: {}]   ;;  %s1916_s8 = inlined_call_operand.vmem [shape: f32[2,80,32], index: 8, kind: output, shape index: {}]  }
   0x1   :  { %1921 = sst [smem:[#allocation7_spill]] %s1911_s3 }
   0x2   :  { %s1630_s27 = smov 0   ;;  %s1632_s28 = smov 0  }
   0x3   :  { %s1634_s29 = smov 0   ;;  %s1636_s30 = smov 0  }
   0x4   :  { %s1638_s9 = smov 0   ;;  %s1640_s10 = smov 0  }
   0x5   :  { %s1642_s11 = smov 0  }
   0x6 LB: > { %1922 = sst [smem:[#allocation4_spill]] %s1547_s10  ;;  %s27_s12 = sadd.s32 1, %s1543_s9  ;;  %s1551_s11 = sphi %s1642_s11, %s18_s11   ;;  %s1547_s10 = sphi %s1640_s10, %s1937_s10   ;;  %s1543_s9 = sphi %s1638_s9, %s1941_s9   ;;  %s1539_s30 = sphi %s1636_s30, %s1935_s30   ;;  %s1535_s29 = sphi %s1634_s29, %s1940_s29   ;;  %s1531_s28 = sphi %s1632_s28, %s1939_s28   ;;  %s1527_s27 = sphi %s1630_s27, %s1938_s27  }
   0x7   : > { %p28_p0 = scmp.ge.s32.totalorder %s27_s12, 3  ;;  %s30_s13 = sadd.s32 1, %s1547_s10 }
   0x8   : > { %s1215_s14 = sadd.s32 4294967295, %s1551_s11   ;;  %p254_p1 = scmp.ne.s32.totalorder %s1531_s28, %s1527_s27 }
   0x9   : > { %s1943_s12 = smov (%p28_p0, %s27_s12), 0  ;;  %s1945_s13 = smov (!%p28_p0, %s30_s13), %s1547_s10 }
   0xa   : > { %1923 = sst [smem:[#allocation5_spill]] %s1943_s12  ;;  %s240_s15 = ssub.s32 %s1543_s9, %s1943_s12 }
   0xb   : > { %p255_p2 = scmp.eq.s32.totalorder %s1215_s14, 5  ;;  %p32_p3 = scmp.ge.s32.totalorder %s1945_s13, 2 }
   0xc   : > { %p1225_p4 = scmp.ge.s32.totalorder %s1551_s11, 1  ;;  %p357_p6 = scmp.lt.s32.totalorder %s1551_s11, 7 }
   0xd   : > { %p1676_p5 = por %p255_p2, %p254_p1  ;;  %s1947_s13 = smov (%p32_p3, %s1945_s13), 0 }
   0xe   : > { %1925 = sst [smem:[#allocation6_spill]] %s1947_s13  ;;  %p358_p7 = pnand %p1225_p4, %p357_p6 }
   0xf   : > { %s239_s17 = ssub.s32 %s1547_s10, %s1947_s13  ;;  %s244_s19 = sadd.s32 1, %s1531_s28  ;;  %vm1920_vm0 = vcmask (!%p358_p7), 261120   ;;  %v1241_v6 = vld [vmem:[%s1912_s4] ss:$0 sm:$0xff] (!%p358_p7)  ;;  %vm686_vm1 = vcmask (!%p358_p7), 523264  }
  0x10   : > { %s241_s18 = sor.u32 %s240_s15, %s239_s17  ;;  %361 = sbr.rel (%p358_p7) target bundleno = 585 (0x249), region = 52 }
  0x11   : > { %p242_p8 = scmp.eq.s32.totalorder %s241_s18, 0  ;;  %s421_s21 = sand.u32 (!%p358_p7), 1, %s1527_s27  }
  0x12   : > { %s1690_s22 = sshll.u32 (!%p358_p7), %s421_s21, 5  ;;  %s1926_s3 = sld [smem:[#allocation7_spill]] (!%p358_p7) }
  0x13   : > { %s1687_s20 = scalar_select %p242_p8, %s1531_s28, %s244_s19  }
  0x14   : > { %p429_p9 = scmp.lt.s32.totalorder (!%p358_p7), %s1539_s30, 1  ;;  %s1229_s14 = sshll.u32 (!%p358_p7), %s1535_s29, 1 }
  0x15   : > { %s1230_s17 = sadd.s32 (!%p358_p7), 4294967295, %s1229_s14  ;;  %s1278_s18 = sadd.s32 (!%p358_p7), 2, %s1229_s14 }
  0x16   : > { %p444_p10 = scmp.gt.s32.totalorder (!%p358_p7), %s1230_s17, 0  ;;  %p462_p11 = scmp.lt.s32.totalorder (!%p358_p7), %s1278_s18, 4 }
  0x17   : > { %s430_s15 = scalar_select %p429_p9, %s1539_s30, 1 }
  0x18   : > { %v1439_v0 = vld [vmem:[%s1926_s3] sm:$0xff]   ;;  %v1440_v1 = vld [vmem:[%s1926_s3 + $0x8] sm:$0xff]   ;;  %s1702_s27 = sshll.u32 %s1535_s29, 2  ;;  %s1949_s17 = smov (!%p444_p10, %s1230_s17), 0 }
  0x19   : > { %1293 = vmatprep.subr.bf16.mxu0 %v1439_v0  ;;  %s1951_s18 = smov (!%p462_p11, %s1278_s18), 4  ;;  %s1231_s19 = sshll.u32 %s1949_s17, 1 }
  0x1a   : > { %1294 = vmatpush3.bf16.msra.mxu0 %v1439_v0  ;;  %p431_p12 = scmp.lt.s32.totalorder %s1702_s27, 9  ;;  %s1317_s21 = smul.u32 10, %s430_s15 }
  0x1b   : > { %1295 = vmatprep.subr.bf16.mxu0 %v1440_v1  ;;  %p449_p13 = scmp.lt.s32.totalorder %s1231_s19, 9  ;;  %s1234_s23 = sshll.u32 %s1951_s18, 1 }
  0x1c   : > { %s432_s24 = scalar_select %p431_p12, %s1702_s27, 9 }
  0x1d   : > { %s1953_s19 = smov (!%p449_p13, %s1231_s19), 9  ;;  %p467_p0 = scmp.lt.s32.totalorder %s1234_s23, 9 }
  0x1e   : > { %1296 = vmatpush3.bf16.msra.mxu0 %v1440_v1  ;;  %s452_s25 = sadd.s32 %s1317_s21, %s1953_s19  ;;  %s434_s14 = sadd.s32 %s1317_s21, %s432_s24 }
  0x1f   : > { %s1232_s26 = sshll.u32 %s452_s25, 2  ;;  %s1228_s10 = sshll.u32 %s434_s14, 2 }
  0x20   : > { %s454_s12 = scalar_lea.vmem %s1909_s1, %s1232_s26  ;;  %s436_s18 = scalar_lea.vmem %s1908_s0, %s1228_s10 }
  0x21   : > { %v1441_v2 = vld [vmem:[%s454_s12] sm:$0xff]   ;;  %s1955_s23 = smov (!%p467_p0, %s1234_s23), 9  ;;  %v1443_v4 = vld [vmem:[%s436_s18 + $0x8] sm:$0xff]   ;;  %s1236_s12 = sshll.u32 %s1535_s29, 5 }
  0x22   : > { %v1442_v3 = vld [vmem:[%s436_s18] sm:$0xff]   ;;  %1297 = vmatprep.mubr.msk.bf16.mxu0 %vm1920_vm0, %v1441_v2  ;;  %s470_s19 = sadd.s32 %s1317_s21, %s1955_s23  ;;  %s696_s10 = sadd.s32 48, %s1236_s12 }
  0x23   : > { %1298 = vmatmul.mubr.msk.bf16.vlgmr.msra.gmra.mrb[0].mxu0 %vm1920_vm0, %v1442_v3  ;;  %s1235_s3 = sshll.u32 %s470_s19, 2  ;;  %p695_p1 = scmp.eq.s32.totalorder %s1535_s29, 0 }
  0x24   : > { %1301 = vmatprep.mubr.msk.bf16.mxu0 %vm1920_vm0, %v1443_v4  ;;  %s472_s25 = scalar_lea.vmem %s1910_s2, %s1235_s3  ;;  %p697_p2 = scmp.gt.s32.totalorder %s696_s10, 80 }
  0x25   : > { %v1444_v5 = vld [vmem:[%s472_s25] sm:$0xff]   ;;  %s1795_s14 = scalar_lea.vmem [#allocation3], %s1690_s22  }
  0x26   : > { %p1723_p3 = por %p697_p2, %p695_p1 }
  0x27   : > { %s1248_s17 = sadd.s32 (%p1723_p3), 4294967280, %s1236_s12 }
  0x2b   : > { %1302 = vmatmul.mubr.msk.bf16.gmra.mrb[4].mxu0 %vm1920_vm0, %v1444_v5 }
  0xf6   : > { %v1299_v7 = vpop.f32.mrb[0].mxu0 }
  0xf7   : > { %v1730_v8 = vadd.f32 %v1299_v7, %v1241_v6  ;;  %v583_v9 = vpop.f32.mrb[1].mxu0 }
  0xf8   : > { %v1732_v10 = vadd.f32 %v1241_v6, %v583_v9  ;;  %v1300_v11 = vpop.f32.mrb[2].mxu0 }
  0xf9   : > { %v616_v12 = vmul.f32 %v1730_v8, %v1730_v8  ;;  %v1736_v13 = vadd.f32 %v1300_v11, %v1241_v6  ;;  %v586_v14 = vpop.f32.mrb[3].mxu0 }
  0xfa   : > { %v614_v15 = vmul.f32 %v1732_v10, %v1732_v10  ;;  %v1740_v16 = vadd.f32 %v1241_v6, %v586_v14 }
  0xfb   : > { %v624_v17 = vmul.f32 %v616_v12, %v1730_v8  ;;  %v617_v18 = vmul.f32 %v1736_v13, %v1736_v13 }
  0xfc   : > { %v622_v19 = vmul.f32 %v614_v15, %v1732_v10  ;;  %v615_v20 = vmul.f32 %v1740_v16, %v1740_v16 }
  0xfd   : > { %v632_v21 = vmul.f32 0.044715, %v624_v17  ;;  %v625_v22 = vmul.f32 %v617_v18, %v1736_v13 }
  0xfe   : > { %v630_v23 = vmul.f32 0.044715, %v622_v19  ;;  %v623_v24 = vmul.f32 %v615_v20, %v1740_v16  ;;  %v1303_v25 = vpop.f32.mrb[4].mxu0 }
  0xff   : > { %v640_v26 = vadd.f32 %v632_v21, %v1730_v8  ;;  %v633_v27 = vmul.f32 0.044715, %v625_v22  ;;  %v1751_v28 = vadd.f32 %v1303_v25, %v1241_v6  ;;  %v599_v29 = vpop.f32.mrb[5].mxu0 }
 0x100   : > { %v638_v30 = vadd.f32 %v630_v23, %v1732_v10  ;;  %v631_v31 = vmul.f32 0.044715, %v623_v24  ;;  %v1754_v32 = vadd.f32 %v1241_v6, %v599_v29  ;;  %v1304_v33 = vpop.f32.mrb[6].mxu0 }
 0x101   : > { %v648_v34 = vmul.f32 0.7978846, %v640_v26  ;;  %v641_v35 = vadd.f32 %v633_v27, %v1736_v13  ;;  %v620_v36 = vmul.f32 %v1751_v28, %v1751_v28  ;;  %v1759_v37 = vadd.f32 %v1304_v33, %v1241_v6  ;;  %v602_v38 = vpop.f32.mrb[7].mxu0 }
 0x102   : > { %v646_v39 = vmul.f32 0.7978846, %v638_v30  ;;  %v639_v40 = vadd.f32 %v631_v31, %v1740_v16  ;;  %v618_v41 = vmul.f32 %v1754_v32, %v1754_v32  ;;  %v1764_v42 = vadd.f32 %v1241_v6, %v602_v38 }
 0x103   : > { %1445 = vtanh.f32 %v648_v34  ;;  %v649_v43 = vmul.f32 0.7978846, %v641_v35  ;;  %v628_v44 = vmul.f32 %v620_v36, %v1751_v28  ;;  %v621_v45 = vmul.f32 %v1759_v37, %v1759_v37 }
 0x104   : > { %1447 = vtanh.f32 %v646_v39  ;;  %v647_v46 = vmul.f32 0.7978846, %v639_v40  ;;  %v626_v47 = vmul.f32 %v618_v41, %v1754_v32  ;;  %v619_v48 = vmul.f32 %v1764_v42, %v1764_v42 }
 0x105   : > { %1449 = vtanh.f32 %v649_v43  ;;  %v636_v49 = vmul.f32 0.044715, %v628_v44  ;;  %v629_v50 = vmul.f32 %v621_v45, %v1759_v37 }
 0x106   : > { %1451 = vtanh.f32 %v647_v46  ;;  %v634_v51 = vmul.f32 0.044715, %v626_v47  ;;  %v627_v52 = vmul.f32 %v619_v48, %v1764_v42 }
 0x107   : > { %v644_v53 = vadd.f32 %v636_v49, %v1751_v28  ;;  %v637_v54 = vmul.f32 0.044715, %v629_v50 }
 0x108   : > { %v642_v55 = vadd.f32 %v634_v51, %v1754_v32  ;;  %v635_v56 = vmul.f32 0.044715, %v627_v52 }
 0x109   : > { %v652_v57 = vmul.f32 0.7978846, %v644_v53  ;;  %v645_v58 = vadd.f32 %v637_v54, %v1759_v37 }
 0x10a   : > { %v650_v59 = vmul.f32 0.7978846, %v642_v55  ;;  %v643_v60 = vadd.f32 %v635_v56, %v1764_v42 }
 0x10b   : > { %1453 = vtanh.f32 %v652_v57  ;;  %v653_v61 = vmul.f32 0.7978846, %v645_v58 }
 0x10c   : > { %1455 = vtanh.f32 %v650_v59  ;;  %v651_v62 = vmul.f32 0.7978846, %v643_v60 }
 0x10d   : > { %v1446_v63 = vpop.eup %1445  ;;  %1457 = vtanh.f32 %v653_v61 }
 0x10e   : > { %v1448_v0 = vpop.eup %1447  ;;  %v664_v1 = vadd.f32 1.0, %v1446_v63  ;;  %1459 = vtanh.f32 %v651_v62 }
 0x10f   : > { %v1450_v2 = vpop.eup %1449  ;;  %v662_v3 = vadd.f32 1.0, %v1448_v0 }
 0x110   : > { %v1452_v4 = vpop.eup %1451  ;;  %v672_v5 = vmul.f32 0.5, %v664_v1  ;;  %v665_v6 = vadd.f32 1.0, %v1450_v2 }
 0x111   : > { %v670_v7 = vmul.f32 0.5, %v662_v3  ;;  %v663_v9 = vadd.f32 1.0, %v1452_v4 }
 0x112   : > { %v680_v11 = vmul.f32 %v672_v5, %v1730_v8  ;;  %v673_v12 = vmul.f32 0.5, %v665_v6 }
 0x113   : > { %v678_v14 = vmul.f32 %v670_v7, %v1732_v10  ;;  %v671_v15 = vmul.f32 0.5, %v663_v9 }
 0x114   : > { %689 = vst.msk [vmem:[#allocation2 + $0x10] sm:$0xff] %vm686_vm1, %v680_v11  ;;  %v681_v17 = vmul.f32 %v673_v12, %v1736_v13 }
 0x115   : > { %v1454_v18 = vpop.eup %1453  ;;  %687 = vst.msk [vmem:[#allocation2] sm:$0xff] %vm686_vm1, %v678_v14  ;;  %v679_v19 = vmul.f32 %v671_v15, %v1740_v16 }
 0x116   : > { %v1456_v20 = vpop.eup %1455  ;;  %690 = vst.msk [vmem:[#allocation2 + $0x18] sm:$0xff] %vm686_vm1, %v681_v17  ;;  %v668_v21 = vadd.f32 1.0, %v1454_v18 }
 0x117   : > { %v1458_v22 = vpop.eup %1457  ;;  %688 = vst.msk [vmem:[#allocation2 + $0x8] sm:$0xff] %vm686_vm1, %v679_v19  ;;  %v666_v8 = vadd.f32 1.0, %v1456_v20 }
 0x118   : > { %v1460_v10 = vpop.eup %1459  ;;  %v676_v23 = vmul.f32 0.5, %v668_v21  ;;  %v669_v24 = vadd.f32 1.0, %v1458_v22 }
 0x119   : > { %v674_v25 = vmul.f32 0.5, %v666_v8  ;;  %v667_v26 = vadd.f32 1.0, %v1460_v10  ;;  %701 = sbr.rel (!%p1723_p3) target bundleno = 300 (0x12c), region = 56 }
 0x11a   : > { %v684_v13 = vmul.f32 %v676_v23, %v1751_v28  ;;  %v677_v27 = vmul.f32 0.5, %v669_v24  ;;  %v703_v28 = vlaneseq (%p1723_p3) }
 0x11b   : > { %v682_v29 = vmul.f32 %v674_v25, %v1754_v32  ;;  %v675_v16 = vmul.f32 0.5, %v667_v26  ;;  %v712_v32 = vstv (%p1723_p3), %s1248_s17  ;;  %v747_v51 = vld [vmem:[#allocation2 + $0x10] sm:$0xff] (%p1723_p3) }
 0x11c   : > { %693 = vst.msk [vmem:[#allocation2 + $0x30] sm:$0xff] %vm686_vm1, %v684_v13  ;;  %v685_v30 = vmul.f32 %v677_v27, %v1759_v37  ;;  %v704_v33 = vshrl.u32 (%p1723_p3), %v703_v28, 7  ;;  %v745_v38 = vld [vmem:[#allocation2] sm:$0xff] (%p1723_p3) }
 0x11d   : > { %691 = vst.msk [vmem:[#allocation2 + $0x20] sm:$0xff] %vm686_vm1, %v682_v29  ;;  %v683_v31 = vmul.f32 %v675_v16, %v1764_v42  ;;  %v748_v52 = vld [vmem:[#allocation2 + $0x18] sm:$0xff] (%p1723_p3) }
 0x11e   : > { %694 = vst.msk [vmem:[#allocation2 + $0x38] sm:$0xff] %vm686_vm1, %v685_v30  ;;  %v713_v34 = vadd.s32 (%p1723_p3), %v712_v32, %v704_v33  ;;  %v705_v35 = vadd.s32 (%p1723_p3), 8, %v704_v33  ;;  %v706_v36 = vadd.s32 (%p1723_p3), 16, %v704_v33  ;;  %v707_v37 = vadd.s32 (%p1723_p3), 24, %v704_v33  ;;  %v746_v45 = vld [vmem:[#allocation2 + $0x8] sm:$0xff] (%p1723_p3) }
 0x11f   : > { %692 = vst.msk [vmem:[#allocation2 + $0x28] sm:$0xff] %vm686_vm1, %v683_v31  ;;  %v708_v39 = vadd.s32 (%p1723_p3), 32, %v704_v33  ;;  %v709_v40 = vadd.s32 (%p1723_p3), 40, %v704_v33  ;;  %v710_v41 = vadd.s32 (%p1723_p3), 48, %v704_v33  ;;  %v711_v42 = vadd.s32 (%p1723_p3), 56, %v704_v33 }
 0x120   : > { %vm721_vm2 = vcmp.ge.s32.totalorder %v713_v34, 0  ;;  %vm729_vm3 = vcmp.lt.s32.totalorder %v713_v34, 80  ;;  %v714_v43 = vadd.s32 %v712_v32, %v705_v35  ;;  %v715_v44 = vadd.s32 %v712_v32, %v706_v36 }
 0x121   : > { %vm737_vm4 = vmand %vm721_vm2, %vm729_vm3  ;;  %v716_v46 = vadd.s32 %v712_v32, %v707_v37  ;;  %v717_v47 = vadd.s32 %v712_v32, %v708_v39  ;;  %v718_v48 = vadd.s32 %v712_v32, %v709_v40  ;;  %v719_v49 = vadd.s32 %v712_v32, %v710_v41 }
 0x122   : > { %v769_v50 = vsel %vm737_vm4, %v745_v38, 0.0  ;;  %vm722_vm5 = vcmp.ge.s32.totalorder %v714_v43, 0  ;;  %vm730_vm6 = vcmp.lt.s32.totalorder %v714_v43, 80  ;;  %vm723_vm7 = vcmp.ge.s32.totalorder %v715_v44, 0 }
 0x123   : > { %777 = vst.msk [vmem:[#allocation2] sm:$0xff] %vm686_vm1, %v769_v50  ;;  %vm738_vm8 = vmand %vm722_vm5, %vm730_vm6  ;;  %vm731_vm9 = vcmp.lt.s32.totalorder %v715_v44, 80  ;;  %vm724_vm10 = vcmp.ge.s32.totalorder %v716_v46, 0  ;;  %vm732_vm11 = vcmp.lt.s32.totalorder %v716_v46, 80  ;;  %vm725_vm12 = vcmp.ge.s32.totalorder %v717_v47, 0  ;;  %v751_v59 = vld [vmem:[#allocation2 + $0x30] sm:$0xff] }
 0x124   : > { %v770_v53 = vsel %vm738_vm8, %v746_v45, 0.0  ;;  %vm739_vm13 = vmand %vm723_vm7, %vm731_vm9  ;;  %vm733_vm14 = vcmp.lt.s32.totalorder %v717_v47, 80  ;;  %v749_v54 = vld [vmem:[#allocation2 + $0x20] sm:$0xff]  ;;  %vm726_vm15 = vcmp.ge.s32.totalorder %v718_v48, 0  ;;  %vm734_vm2 = vcmp.lt.s32.totalorder %v718_v48, 80 }
 0x125   : > { %778 = vst.msk [vmem:[#allocation2 + $0x8] sm:$0xff] %vm686_vm1, %v770_v53  ;;  %v771_v55 = vsel %vm739_vm13, %v747_v51, 0.0  ;;  %vm740_vm3 = vmand %vm724_vm10, %vm732_vm11  ;;  %vm727_vm4 = vcmp.ge.s32.totalorder %v719_v49, 0  ;;  %vm735_vm0 = vcmp.lt.s32.totalorder %v719_v49, 80  ;;  %v720_v57 = vadd.s32 %v712_v32, %v711_v42  ;;  %v752_v61 = vld [vmem:[#allocation2 + $0x38] sm:$0xff] }
 0x126   : > { %v750_v56 = vld [vmem:[#allocation2 + $0x28] sm:$0xff]  ;;  %779 = vst.msk [vmem:[#allocation2 + $0x10] sm:$0xff] %vm686_vm1, %v771_v55  ;;  %v772_v58 = vsel %vm740_vm3, %v748_v52, 0.0  ;;  %vm741_vm5 = vmand %vm725_vm12, %vm733_vm14 }
 0x127   : > { %780 = vst.msk [vmem:[#allocation2 + $0x18] sm:$0xff] %vm686_vm1, %v772_v58  ;;  %v773_v60 = vsel %vm741_vm5, %v749_v54, 0.0  ;;  %vm742_vm6 = vmand %vm726_vm15, %vm734_vm2  ;;  %vm728_vm7 = vcmp.ge.s32.totalorder %v720_v57, 0  ;;  %vm736_vm8 = vcmp.lt.s32.totalorder %v720_v57, 80 }
 0x128   : > { %781 = vst.msk [vmem:[#allocation2 + $0x20] sm:$0xff] %vm686_vm1, %v773_v60  ;;  %v774_v62 = vsel %vm742_vm6, %v750_v56, 0.0  ;;  %vm743_vm9 = vmand %vm727_vm4, %vm735_vm0 }
 0x129   : > { %782 = vst.msk [vmem:[#allocation2 + $0x28] sm:$0xff] %vm686_vm1, %v774_v62  ;;  %v775_v63 = vsel %vm743_vm9, %v751_v59, 0.0  ;;  %vm744_vm10 = vmand %vm728_vm7, %vm736_vm8 }
 0x12a   : > { %783 = vst.msk [vmem:[#allocation2 + $0x30] sm:$0xff] %vm686_vm1, %v775_v63  ;;  %v776_v0 = vsel %vm744_vm10, %v752_v61, 0.0 }
 0x12b   : > { %784 = vst.msk [vmem:[#allocation2 + $0x38] sm:$0xff] %vm686_vm1, %v776_v0 }
 0x12c PF: > { %v1461_v1 = vld [vmem:[%s1914_s6] sm:$0xff]   ;;  %v790_v2 = vlaneseq  ;;  %v1462_v3 = vld [vmem:[%s1914_s6 + $0x8] sm:$0xff]   ;;  %v1463_v5 = vld [vmem:[%s1914_s6 + $0x10] sm:$0xff]   ;;  %vm1928_vm0 = vcmask 261120   ;;  %s938_s21 = ssub.s32 (%p1676_p5), 10, %s1702_s27  ;;  %s1318_s23 = smul.u32 (%p1676_p5), 10, %s1539_s30 }
 0x12d   : > { %1305 = vmatprep.subr.bf16.mxu1 %v1461_v1  ;;  %v785_v6 = vld [vmem:[%s1913_s5] sm:$0x7]  ;;  %v786_v7 = vld [vmem:[#allocation2 + $0xf] sm:$0xff]  ;;  %v1464_v25 = vld [vmem:[%s1914_s6 + $0x18] sm:$0xff]   ;;  %p939_p4 = scmp.lt.s32.totalorder (%p1676_p5), %s938_s21, 4 }
 0x12e   : > { %v791_v4 = vshrl.u32 %v790_v2, 7  ;;  %1306 = vmatpush3.bf16.msra.mxu1 %v1461_v1  ;;  %v787_v9 = vld [vmem:[#allocation2 + $0x17] sm:$0xff]  ;;  %v1249_v48 = vld [vmem:[%s1915_s7] ss:$0 sm:$0xff]  ;;  %vm1929_vm11 = vmmov %vm1928_vm0  ;;  %s944_s17 = sadd.s32 (%p1676_p5), %s1318_s23, %s1702_s27 }
 0x12f   : > { %1307 = vmatprep.subr.bf16.mxu1 %v1462_v3  ;;  %v798_v14 = vld [vmem:[#allocation2 + $0x10] sm:$0xff]  ;;  %v799_v15 = vld [vmem:[#allocation2 + $0x18] sm:$0xff]  ;;  %vm1930_vm12 = vmmov %vm1928_vm0  ;;  %s1260_s29 = sshll.u32 (%p1676_p5), %s944_s17, 3 }
 0x130   : > { %v792_v11 = vsub.s32 0, %v791_v4  ;;  %v804_v12 = vsub.s32 1, %v791_v4  ;;  %v814_v17 = vld [vmem:[#allocation2 + $0x11] sm:$0xff]  ;;  %v820_v18 = vsub.s32 2, %v791_v4  ;;  %v815_v21 = vld [vmem:[#allocation2 + $0x19] sm:$0xff]  ;;  %vm1931_vm13 = vmmov %vm1928_vm0  ;;  %s1851_s19 = scalar_lea.vmem (%p1676_p5), %s1916_s8, %s1260_s29  }
 0x131   : > { %v788_v22 = vld [vmem:[#allocation2 + $0x1f] sm:$0xff] }
 0x132   : > { %v793_v19 = vrot.slane %v785_v6, %v792_v11  ;;  %v805_v20 = vrot.slane %v785_v6, %v804_v12  ;;  %v789_v8 = vld [vmem:[#allocation2 + $0x27] sm:$0xff]  ;;  %1308 = vmatpush3.bf16.msra.mxu1 %v1462_v3  ;;  %v821_v10 = vrot.slane %v785_v6, %v820_v18 }
 0x133   : > { %v800_v23 = vld [vmem:[#allocation2 + $0x20] sm:$0xff]  ;;  %v801_v24 = vld [vmem:[#allocation2 + $0x28] sm:$0xff]  ;;  %1309 = vmatprep.subr.bf16.mxu1 %v1463_v5 }
 0x134   : > { %v794_v26 = vmul.f32 %v793_v19, %v786_v7  ;;  %v795_v13 = vmul.f32 %v793_v19, %v787_v9  ;;  %v806_v27 = vmul.f32 %v805_v20, %v798_v14  ;;  %v807_v29 = vmul.f32 %v805_v20, %v799_v15  ;;  %v816_v16 = vld [vmem:[#allocation2 + $0x21] sm:$0xff]  ;;  %v817_v30 = vld [vmem:[#allocation2 + $0x29] sm:$0xff] }
 0x135   : > { %v822_v31 = vmul.f32 %v821_v10, %v814_v17  ;;  %v823_v28 = vmul.f32 %v821_v10, %v815_v21  ;;  %v796_v32 = vmul.f32 %v793_v19, %v788_v22  ;;  %v797_v33 = vmul.f32 %v793_v19, %v789_v8 }
 0x136   : > { %v810_v34 = vadd.f32 %v806_v27, %v794_v26  ;;  %v811_v35 = vadd.f32 %v807_v29, %v795_v13  ;;  %v808_v36 = vmul.f32 %v805_v20, %v800_v23  ;;  %v809_v37 = vmul.f32 %v805_v20, %v801_v24  ;;  %1310 = vmatpush3.bf16.msra.mxu1 %v1463_v5 }
 0x137   : > { %v824_v38 = vmul.f32 %v821_v10, %v816_v16  ;;  %v825_v39 = vmul.f32 %v821_v10, %v817_v30  ;;  %1311 = vmatprep.subr.bf16.mxu1 %v1464_v25 }
 0x138   : > { %v826_v40 = vadd.f32 %v822_v31, %v810_v34  ;;  %v827_v41 = vadd.f32 %v823_v28, %v811_v35  ;;  %v812_v42 = vadd.f32 %v808_v36, %v796_v32  ;;  %v813_v43 = vadd.f32 %v809_v37, %v797_v33 }
 0x13a   : > { %v830_v44 = vpack.c.bf16 %v827_v41, %v826_v40  ;;  %v828_v45 = vadd.f32 %v824_v38, %v812_v42  ;;  %v829_v46 = vadd.f32 %v825_v39, %v813_v43  ;;  %1312 = vmatpush3.bf16.msra.mxu1 %v1464_v25 }
 0x13c   : > { %1313 = vmatprep.mubr.msk.bf16.mxu1 %vm686_vm1, %v830_v44  ;;  %v831_v47 = vpack.c.bf16 %v829_v46, %v828_v45 }
 0x13e   : > { %1314 = vmatmul.mubr.msk.bf16.vlgmr.msra.gmra.mrb[0].mxu1 %vm686_vm1, %v831_v47 }
 0x211   : > { %v1315_v49 = vpop.f32.mrb[0].mxu1  ;;  %936 = sbr.rel (!%p1676_p5) target bundleno = 585 (0x249), region = 60 }
 0x212   : > { %v920_v50 = vadd.f32 %v1315_v49, %v1249_v48  ;;  %v911_v51 = vpop.f32.mrb[1].mxu1 }
 0x213   : > { %v912_v52 = vadd.f32 %v1249_v48, %v911_v51  ;;  %v1316_v53 = vpop.f32.mrb[2].mxu1 }
 0x214   : > { %928 = vst.msk [vmem:[%s1795_s14 + $0x10] sm:$0xff] %vm1928_vm0, %v920_v50  ;;  %v923_v54 = vadd.f32 %v1316_v53, %v1249_v48  ;;  %v914_v55 = vpop.f32.mrb[3].mxu1 }
 0x215   : > { %926 = vst.msk [vmem:[%s1795_s14] sm:$0xff] %vm1929_vm11, %v912_v52  ;;  %v915_v56 = vadd.f32 %v1249_v48, %v914_v55 }
 0x216   : > { %929 = vst.msk [vmem:[%s1795_s14 + $0x18] sm:$0xff] %vm1930_vm12, %v923_v54 }
 0x217   : > { %927 = vst.msk [vmem:[%s1795_s14 + $0x8] sm:$0xff] %vm1931_vm13, %v915_v56 }
 0x218   : > { %s1957_s21 = smov (!%p939_p4, %s938_s21), 4 }
 0x219   : > { %s1258_s22 = sshll.u32 %s1957_s21, 7 }
 0x21a   : > { %p1261_p6 = scmp.eq.s32.totalorder %s1258_s22, 0 }
 0x21b   : > { %s1854_s16 = sshrl.u32 (!%p1261_p6), %s1957_s21, 2 }
 0x21c   : > { %949 = sbr.rel (%p1261_p6) target bundleno = 585 (0x249), region = 64  ;;  %p1262_p5 = scmp.le.s32.totalorder (!%p1261_p6), %s1854_s16, 0 }
 0x223   : > { %1148 = sbr.rel (%p1262_p5) target bundleno = 564 (0x234), region = 146  ;;  %s1932_s30 = smov (!%p1262_p5), %s1851_s19 }
 0x224   : > { %s1933_s27 = smov (!%p1262_p5), %s1795_s14  ;;  %s1863_s3 = smov (!%p1262_p5), 0  }
 0x225   : > { %s1565_s13 = smov (!%p1262_p5), 0  }
 0x22a LB: >> { %v1017_v57 = vld [vmem:[%s1559_s27] sm:$0xff]  ;;  %v1019_v58 = vld [vmem:[%s1559_s27 + $0x8] sm:$0xff]  ;;  %v1021_v59 = vld [vmem:[%s1559_s27 + $0x10] sm:$0xff]  ;;  %s1025_s24 = sadd.s32 1, %s1563_s3  ;;  %s1011_s13 = sadd.s32 1, %s1567_s13   ;;  %s1567_s13 = sphi %s1565_s13, %s1011_s13   ;;  %s1563_s3 = sphi %s1863_s3, %s1934_s3   ;;  %s1559_s27 = sphi %s1933_s27, %s1030_s27   ;;  %s1555_s30 = sphi %s1932_s30, %s1031_s30  }
 0x22b   : >> { %1018 = vst [vmem:[%s1555_s30] sm:$0xff] %v1017_v57  ;;  %1020 = vst [vmem:[%s1555_s30 + $0x8] sm:$0xff] %v1019_v58  ;;  %v1023_v60 = vld [vmem:[%s1559_s27 + $0x18] sm:$0xff]  ;;  %p1026_p7 = scmp.ge.s32.totalorder %s1025_s24, %s1854_s16  ;;  %p1010_p8 = scmp.ge.s32.totalorder %s1011_s13, %s1854_s16 }
 0x22c   : >> { %1022 = vst [vmem:[%s1555_s30 + $0x10] sm:$0xff] %v1021_v59  ;;  %1024 = vst [vmem:[%s1555_s30 + $0x18] sm:$0xff] %v1023_v60 }
 0x22d   : >> { %s1959_s24 = smov (%p1026_p7, %s1025_s24), 0  ;;  %1013 = sbr.rel (!%p1010_p8) target bundleno = 554 (0x22a), region = 152 }
 0x22e   : >> { %s1263_s25 = sshll.u32 %s1959_s24, 5  ;;  %s1934_s3 = smov %s1959_s24 }
 0x22f   : >> { %s1030_s27 = scalar_lea.vmem %s1795_s14, %s1263_s25 [#allocation3]   ;;  %s1031_s30 = scalar_lea.vmem %s1851_s19, %s1263_s25  }
 0x234 PF: > { %s1879_s12 = sand.u32 3, %s1957_s21   ;;  %s1279_s10 = sshll.u32 %s1854_s16, 5 }
 0x235   : > { %s1036_s26 = scalar_lea.vmem %s1795_s14, %s1279_s10 [#allocation3]   ;;  %s1038_s23 = scalar_lea.vmem %s1851_s19, %s1279_s10  }
 0x236   : > { %p1268_p9 = scmp.le.s32.totalorder %s1879_s12, 0 }
 0x237   : > { %s1569_s17 = smov (!%p1268_p9), %s1038_s23   ;;  %s1573_s29 = smov (!%p1268_p9), %s1036_s26  }
 0x238   : > { %1162 = sbr.rel (%p1268_p9) target bundleno = 585 (0x249), region = 157  ;;  %s1577_s22 = smov (!%p1268_p9), 0  }
 0x239   : > { %s1581_s15 = smov (!%p1268_p9), 0  }
 0x23f LB: >> { %v1048_v61 = vld [vmem:[%s1575_s29] sm:$0xff]  ;;  %s1050_s21 = sadd.s32 1, %s1579_s22  ;;  %s1042_s15 = sadd.s32 1, %s1583_s15   ;;  %s1583_s15 = sphi %s1581_s15, %s1042_s15   ;;  %s1579_s22 = sphi %s1577_s22, %s1578_s22   ;;  %s1575_s29 = sphi %s1573_s29, %s1055_s29   ;;  %s1571_s17 = sphi %s1569_s17, %s1056_s17  }
 0x240   : >> { %1049 = vst [vmem:[%s1571_s17] sm:$0xff] %v1048_v61  ;;  %p1051_p10 = scmp.ge.s32.totalorder %s1050_s21, %s1879_s12  ;;  %p1041_p11 = scmp.ge.s32.totalorder %s1042_s15, %s1879_s12 }
 0x242   : >> { %s1961_s21 = smov (%p1051_p10, %s1050_s21), 0  ;;  %1044 = sbr.rel (!%p1041_p11) target bundleno = 575 (0x23f), region = 163 }
 0x243   : >> { %s1269_s14 = sshll.u32 %s1961_s21, 3  ;;  %s1578_s22 = smov %s1961_s21  }
 0x244   : >> { %s1055_s29 = scalar_lea.vmem %s1036_s26, %s1269_s14 [#allocation3]   ;;  %s1056_s17 = scalar_lea.vmem %s1038_s23, %s1269_s14  }
 0x249 PF: > { %s18_s11 = sadd.s32 1, %s1551_s11   ;;  %s1935_s30 = sld [smem:[#allocation4_spill]] }
 0x24a   : > { %p15_p12 = scmp.ge.s32.totalorder %s18_s11, 8   ;;  %s1936_s18 = sld [smem:[#allocation5_spill]] }
 0x24b   : > { %s1937_s10 = sld [smem:[#allocation6_spill]]  ;;  %s1938_s27 = smov %s1531_s28 }
 0x24c   : > { %s1939_s28 = smov %s1687_s20  ;;  %s1940_s29 = smov %s1543_s9 }
 0x24d   :  { %17 = sbr.rel (!%p15_p12) target bundleno = 6 (0x6), region = 174 }
 0x250   : > { %s1941_s9 = smov %s1936_s18 }

</bundles_post_ra>
